<compile_context>
chip_gen: v7x
topology: tpu7x:2x2x1
jax: 0.10.0
libtpu: 0.0.40
codegen_flags: <defaults>
</compile_context>

<pallas_src>
import functools

import jax
import jax.numpy as jnp
from jax import lax
from jax.experimental import pallas as pl
from jax.experimental.pallas import tpu as pltpu

_LANE = 128      # vreg lane width
_SUBLANE = 8     # f32 sublane width


def _round_up(n, m):
    return ((n + m - 1) // m) * m


def _lstm_chunk_kernel(x_ref, w_ih_ref, w_hh_ref, b_ref, w_fc_ref, b_fc_ref,
                       out_ref, gx_ref, h_ref, c_ref, *, T, Tc, Bc, H, padded):
    """One (batch-chunk, time-chunk) grid step.

    x_ref    : (Tc*Bc, I)   bf16  time-major chunk of the input (t-major, batch-minor rows)
    w_ih_ref : (I,  G4)     bf16  gate order [i, f, o, g]; 4H zero-padded to G4 lanes
    w_hh_ref : (H,  G4)     bf16
    b_ref    : (1,  G4)     f32   b_ih + b_hh
    w_fc_ref : (H,  Cp)     bf16
    b_fc_ref : (1,  Cp)     f32
    out_ref  : (Bc, Cp)     f32   lane-dense logits (written at the last time chunk)
    gx_ref   : (Tc*Bc, G4)  f32   scratch: hoisted x @ W_ih + b for this chunk
    h_ref/c_ref : (Bc, H)   f32   recurrent state carried across time chunks
    """
    t_chunk = pl.program_id(1)
    nt = pl.num_programs(1)

    @pl.when(t_chunk == 0)
    def _init():
        h_ref[...] = jnp.zeros_like(h_ref)
        c_ref[...] = jnp.zeros_like(c_ref)

    # Hoisted input projection for the whole chunk: ONE bf16 MXU matmul, f32 accumulate.
    gx_ref[...] = (
        jnp.dot(x_ref[...], w_ih_ref[...], preferred_element_type=jnp.float32)
        + b_ref[...])

    # TODO(synk): keep W_hh weight-stationary across steps with pltpu.matmul_push_rhs /
    # matmul_acc_lhs / matmul_pop so the RHS is not re-pushed through the systolic array
    # on every serial recurrence step.
    w_hh = w_hh_ref[...]                                     # (H, G4) bf16, resident

    def step(t, carry):
        h, c = carry                                         # f32 state
        row = pl.multiple_of(t * Bc, Bc)
        gates = gx_ref[pl.ds(row, Bc), :] + jnp.dot(
            h.astype(jnp.bfloat16), w_hh, preferred_element_type=jnp.float32)
        # Gate order [i, f, o, g]: one sigmoid over the first 3H lanes, one tanh on the rest.
        sig = jax.nn.sigmoid(gates[:, :3 * H])
        g_g = jnp.tanh(gates[:, 3 * H:4 * H])
        i_g = sig[:, 0 * H:1 * H]
        f_g = sig[:, 1 * H:2 * H]
        o_g = sig[:, 2 * H:3 * H]
        c_new = f_g * c + i_g * g_g
        h_new = o_g * jnp.tanh(c_new)
        if padded:  # static: only emitted when T was padded up to a multiple of Tc
            valid = (t_chunk * Tc + t) < T
            h_new = jnp.where(valid, h_new, h)
            c_new = jnp.where(valid, c_new, c)
        return h_new, c_new

    # Trip count is bounded by the time-chunk size, so full unroll is already capped.
    h_last, c_last = lax.fori_loop(0, Tc, step, (h_ref[...], c_ref[...]), unroll=True)
    h_ref[...] = h_last
    c_ref[...] = c_last

    @pl.when(t_chunk == nt - 1)
    def _finalize():
        # Dropout(p=0.2) is identity at inference time.
        # TODO(synk): training-mode dropout (random masking) not implemented.
        logits = (jnp.dot(h_last.astype(jnp.bfloat16), w_fc_ref[...],
                          preferred_element_type=jnp.float32)
                  + b_fc_ref[...])
        out_ref[...] = logits.astype(out_ref.dtype)


def lstm_classifier(x, w_ih, w_hh, b_ih, b_hh, w_fc, b_fc, *, t_chunk=8, b_chunk=128):
    """x: (B, T, I) batch-first, like PyTorch. Returns f32 logits (B, num_classes)."""
    B, T, I = x.shape
    H = w_hh.shape[1]
    C = w_fc.shape[0]

    # Batch chunking ("parallel" grid axis; each chunk feeds the MXU Bc rows at once).
    Bc = _round_up(min(max(b_chunk, 1), _round_up(B, _SUBLANE)), _SUBLANE)
    Bp = _round_up(B, Bc)
    nb = Bp // Bc

    # Time chunking ("arbitrary" grid axis; bounds unroll + gx scratch, streams x from HBM).
    Tc = max(1, min(t_chunk, T))
    T_pad = _round_up(T, Tc)
    nt = T_pad // Tc
    padded = (T_pad != T)

    G4 = _round_up(4 * H, _LANE)   # packed gates; only the TOTAL 4H is lane-padded
    Cp = _round_up(C, _LANE)       # lane-dense logits

    # --- input: time-major, padded, chunked to (nb, nt, Tc*Bc, I), bf16 MXU operand. ---
    x_tm = jnp.transpose(x, (1, 0, 2))                              # (T, B, I)
    x_tm = jnp.pad(x_tm, ((0, T_pad - T), (0, Bp - B), (0, 0)))     # (T_pad, Bp, I)
    x_r = (x_tm.reshape(nt, Tc, nb, Bc, I)
               .transpose(2, 0, 1, 3, 4)
               .reshape(nb, nt, Tc * Bc, I)
               .astype(jnp.bfloat16))

    # --- weights: PyTorch packs gate rows [i; f; g; o]; reorder to [i, f, o, g] so the
    #     kernel applies one sigmoid to [:, :3H] and one tanh to [:, 3H:4H]. ---
    perm = jnp.array([0, 1, 3, 2])
    w_ih_t = jnp.transpose(w_ih.reshape(4, H, I)[perm], (2, 0, 1)).reshape(I, 4 * H)
    w_ih_t = jnp.pad(w_ih_t, ((0, 0), (0, G4 - 4 * H))).astype(jnp.bfloat16)
    w_hh_t = jnp.transpose(w_hh.reshape(4, H, H)[perm], (2, 0, 1)).reshape(H, 4 * H)
    w_hh_t = jnp.pad(w_hh_t, ((0, 0), (0, G4 - 4 * H))).astype(jnp.bfloat16)
    b = (b_ih + b_hh).reshape(4, H)[perm].reshape(1, 4 * H)
    b = jnp.pad(b, ((0, 0), (0, G4 - 4 * H))).astype(jnp.float32)

    w_fc_t = jnp.pad(jnp.transpose(w_fc), ((0, 0), (0, Cp - C))).astype(jnp.bfloat16)
    b_fc2 = jnp.pad(b_fc, (0, Cp - C)).reshape(1, Cp).astype(jnp.float32)

    # --- generation-aware VMEM budget: real footprint + headroom, capped by capacity. ---
    footprint = (2 * (Tc * Bc * I) * 2             # x chunk (bf16), double-buffered
                 + (I + H) * G4 * 2 + H * Cp * 2   # bf16 weights
                 + (G4 + Cp) * 4                   # f32 biases
                 + Tc * Bc * G4 * 4                # gx scratch
                 + 2 * Bc * H * 4                  # h / c carries
                 + 2 * Bc * Cp * 4)                # out block, double-buffered
    try:
        cap = getattr(pltpu.get_tpu_info(), "vmem_capacity_bytes", 64 << 20)
    except Exception:
        cap = 64 << 20
    vmem_limit = int(min(max(2 * footprint, 16 << 20), cap - (4 << 20)))

    kernel = functools.partial(_lstm_chunk_kernel, T=T, Tc=Tc, Bc=Bc, H=H, padded=padded)

    out_p = pl.pallas_call(
        kernel,
        out_shape=jax.ShapeDtypeStruct((Bp, Cp), jnp.float32),
        grid_spec=pltpu.PrefetchScalarGridSpec(
            num_scalar_prefetch=0,
            grid=(nb, nt),
            in_specs=[
                pl.BlockSpec((None, None, Tc * Bc, I), lambda bi, ti: (bi, ti, 0, 0)),
                pl.BlockSpec((I, G4), lambda bi, ti: (0, 0)),
                pl.BlockSpec((H, G4), lambda bi, ti: (0, 0)),
                pl.BlockSpec((1, G4), lambda bi, ti: (0, 0)),
                pl.BlockSpec((H, Cp), lambda bi, ti: (0, 0)),
                pl.BlockSpec((1, Cp), lambda bi, ti: (0, 0)),
            ],
            out_specs=pl.BlockSpec((Bc, Cp), lambda bi, ti: (bi, 0)),
            scratch_shapes=[
                pltpu.VMEM((Tc * Bc, G4), jnp.float32),   # per-chunk input projection
                pltpu.VMEM((Bc, H), jnp.float32),         # h carry
                pltpu.VMEM((Bc, H), jnp.float32),         # c carry
            ],
        ),
        compiler_params=pltpu.CompilerParams(
            dimension_semantics=("parallel", "arbitrary"),
            vmem_limit_bytes=vmem_limit,
        ),
    )(x_r, w_ih_t, w_hh_t, b, w_fc_t, b_fc2)

    return out_p[:B, :C]


def _reference(x, w_ih, w_hh, b_ih, b_hh, w_fc, b_fc):
    """Pure-JAX f32 reference mirroring torch.nn.LSTM + Linear (eval mode)."""
    B, T, I = x.shape
    H = w_hh.shape[1]
    h = jnp.zeros((B, H), jnp.float32)
    c = jnp.zeros((B, H), jnp.float32)
    for t in range(T):
        gates = x[:, t, :] @ w_ih.T + b_ih + h @ w_hh.T + b_hh
        i_g = jax.nn.sigmoid(gates[:, 0:H])
        f_g = jax.nn.sigmoid(gates[:, H:2 * H])
        g_g = jnp.tanh(gates[:, 2 * H:3 * H])
        o_g = jax.nn.sigmoid(gates[:, 3 * H:4 * H])
        c = f_g * c + i_g * g_g
        h = o_g * jnp.tanh(c)
    return h @ w_fc.T + b_fc


if __name__ == "__main__":
    B, T, input_size, hidden_size, num_classes = 2, 8, 16, 32, 4

    key = jax.random.PRNGKey(0)
    ks = jax.random.split(key, 7)
    scale = 1.0 / jnp.sqrt(hidden_size)

    x = jax.random.normal(ks[0], (B, T, input_size), dtype=jnp.float32)
    # PyTorch nn.LSTM parameter shapes (gate order i, f, g, o):
    w_ih = jax.random.uniform(ks[1], (4 * hidden_size, input_size), minval=-scale, maxval=scale)
    w_hh = jax.random.uniform(ks[2], (4 * hidden_size, hidden_size), minval=-scale, maxval=scale)
    b_ih = jax.random.uniform(ks[3], (4 * hidden_size,), minval=-scale, maxval=scale)
    b_hh = jax.random.uniform(ks[4], (4 * hidden_size,), minval=-scale, maxval=scale)
    # nn.Linear(hidden_size, num_classes)
    w_fc = jax.random.uniform(ks[5], (num_classes, hidden_size), minval=-scale, maxval=scale)
    b_fc = jax.random.uniform(ks[6], (num_classes,), minval=-scale, maxval=scale)

    ref = _reference(x, w_ih, w_hh, b_ih, b_hh, w_fc, b_fc)

    # Single time chunk (whole sequence resident); bf16 MXU operands -> loosened tolerance.
    out = jax.block_until_ready(lstm_classifier(x, w_ih, w_hh, b_ih, b_hh, w_fc, b_fc))
    assert out.shape == (B, num_classes)
    assert jnp.allclose(out, ref, atol=5e-2, rtol=5e-2), (out, ref)

    # Multi-chunk path (T streamed in chunks of 3): exercises the h/c carry across the
    # time grid axis and the padded-timestep guard.
    out2 = jax.block_until_ready(
        lstm_classifier(x, w_ih, w_hh, b_ih, b_hh, w_fc, b_fc, t_chunk=3))
    assert jnp.allclose(out2, ref, atol=5e-2, rtol=5e-2), (out2, ref)

    print("KERNEL_OK")
</pallas_src>

<mosaic_0001>
module attributes {stable_mosaic.version = 11 : i64} {
  func.func @_lstm_chunk_kernel(%arg0: i32, %arg1: i32, %arg2: memref<1x1x64x16xbf16, #tpu.memory_space<vmem>>, %arg3: memref<16x128xbf16, #tpu.memory_space<vmem>>, %arg4: memref<32x128xbf16, #tpu.memory_space<vmem>>, %arg5: memref<1x128xf32, #tpu.memory_space<vmem>>, %arg6: memref<32x128xbf16, #tpu.memory_space<vmem>>, %arg7: memref<1x128xf32, #tpu.memory_space<vmem>>, %arg8: memref<8x128xf32, #tpu.memory_space<vmem>>, %arg9: memref<64x128xf32, #tpu.memory_space<vmem>>, %arg10: memref<8x32xf32, #tpu.memory_space<vmem>>, %arg11: memref<8x32xf32, #tpu.memory_space<vmem>>) attributes {dimension_semantics = [#tpu.dimension_semantics<parallel>, #tpu.dimension_semantics<arbitrary>], iteration_bounds = array<i64: 1, 1>, scalar_prefetch = 0 : i64, scratch_operands = 3 : i64, tpu.core_type = #tpu.core_type<tc>, window_params = [{transform_indices = @transform_0, window_bounds = array<i64: 1, 1, 64, 16>}, {pipeline_mode = #tpu.pipeline_mode<synchronous>, transform_indices = @transform_1, window_bounds = array<i64: 16, 128>}, {pipeline_mode = #tpu.pipeline_mode<synchronous>, transform_indices = @transform_2, window_bounds = array<i64: 32, 128>}, {pipeline_mode = #tpu.pipeline_mode<synchronous>, transform_indices = @transform_3, window_bounds = array<i64: 1, 128>}, {pipeline_mode = #tpu.pipeline_mode<synchronous>, transform_indices = @transform_4, window_bounds = array<i64: 32, 128>}, {pipeline_mode = #tpu.pipeline_mode<synchronous>, transform_indices = @transform_5, window_bounds = array<i64: 1, 128>}, {transform_indices = @transform_6, window_bounds = array<i64: 8, 128>}]} {
    %c0_i32 = arith.constant 0 : i32
    %0 = arith.cmpi eq, %arg1, %c0_i32 : i32
    %1 = arith.extui %0 : i1 to i32
    %c0_i32_0 = arith.constant 0 : i32
    %2 = arith.cmpi ne, %1, %c0_i32_0 : i32
    scf.if %2 {
      %cst_55 = arith.constant 0.000000e+00 : f32
      %203 = vector.broadcast %cst_55 : f32 to vector<8x32xf32>
      %c0_56 = arith.constant 0 : index
      %c0_57 = arith.constant 0 : index
      %204 = vector.load %arg10[%c0_56, %c0_57] : memref<8x32xf32, #tpu.memory_space<vmem>>, vector<8x32xf32>
      tpu.vector_store %arg10[%c0_56, %c0_57], %203 {strides = array<i32>} : memref<8x32xf32, #tpu.memory_space<vmem>>, vector<8x32xf32>,
      %cst_58 = arith.constant 0.000000e+00 : f32
      %205 = vector.broadcast %cst_58 : f32 to vector<8x32xf32>
      %c0_59 = arith.constant 0 : index
      %c0_60 = arith.constant 0 : index
      %206 = vector.load %arg11[%c0_59, %c0_60] : memref<8x32xf32, #tpu.memory_space<vmem>>, vector<8x32xf32>
      tpu.vector_store %arg11[%c0_59, %c0_60], %205 {strides = array<i32>} : memref<8x32xf32, #tpu.memory_space<vmem>>, vector<8x32xf32>,
    } else {
    }
    %c0 = arith.constant 0 : index
    %c0_1 = arith.constant 0 : index
    %c0_2 = arith.constant 0 : index
    %c0_3 = arith.constant 0 : index
    %3 = vector.load %arg2[%c0, %c0_1, %c0_2, %c0_3] : memref<1x1x64x16xbf16, #tpu.memory_space<vmem>>, vector<1x1x64x16xbf16>
    %4 = vector.shape_cast %3 : vector<1x1x64x16xbf16> to vector<64x16xbf16>
    %c0_4 = arith.constant 0 : index
    %c0_5 = arith.constant 0 : index
    %5 = vector.load %arg3[%c0_4, %c0_5] : memref<16x128xbf16, #tpu.memory_space<vmem>>, vector<16x128xbf16>
    %cst = arith.constant dense<0.000000e+00> : vector<64x128xf32>
    %6 = tpu.matmul %4, %5, %cst {dimension_numbers = #tpu.dot_dimension_numbers<[1], [0], [0], [1], [0, 0, 1, 1], [], []>} : vector<64x16xbf16>, vector<16x128xbf16>, vector<64x128xf32> -> vector<64x128xf32>
    %c0_6 = arith.constant 0 : index
    %c0_7 = arith.constant 0 : index
    %7 = vector.load %arg5[%c0_6, %c0_7] : memref<1x128xf32, #tpu.memory_space<vmem>>, vector<1x128xf32>
    %8 = vector.broadcast %7 : vector<1x128xf32> to vector<64x128xf32>
    %9 = arith.addf %6, %8 : vector<64x128xf32>
    %c0_8 = arith.constant 0 : index
    %c0_9 = arith.constant 0 : index
    %10 = vector.load %arg9[%c0_8, %c0_9] : memref<64x128xf32, #tpu.memory_space<vmem>>, vector<64x128xf32>
    tpu.vector_store %arg9[%c0_8, %c0_9], %9 {strides = array<i32>} : memref<64x128xf32, #tpu.memory_space<vmem>>, vector<64x128xf32>,
    %c0_10 = arith.constant 0 : index
    %c0_11 = arith.constant 0 : index
    %11 = vector.load %arg4[%c0_10, %c0_11] : memref<32x128xbf16, #tpu.memory_space<vmem>>, vector<32x128xbf16>
    %c0_12 = arith.constant 0 : index
    %c0_13 = arith.constant 0 : index
    %12 = vector.load %arg10[%c0_12, %c0_13] : memref<8x32xf32, #tpu.memory_space<vmem>>, vector<8x32xf32>
    %c0_14 = arith.constant 0 : index
    %c0_15 = arith.constant 0 : index
    %13 = vector.load %arg11[%c0_14, %c0_15] : memref<8x32xf32, #tpu.memory_space<vmem>>, vector<8x32xf32>
    %c0_i32_16 = arith.constant 0 : i32
    %c8_i32 = arith.constant 8 : i32
    %14 = arith.muli %c0_i32_16, %c8_i32 : i32
    %15 = tpu.assume_multiple %14, 8 : i32
    %16 = arith.index_cast %15 : i32 to index
    %c0_17 = arith.constant 0 : index
    %17 = vector.load %arg9[%16, %c0_17] : memref<64x128xf32, #tpu.memory_space<vmem>>, vector<8x128xf32>
    %18 = arith.truncf %12 : vector<8x32xf32> to vector<8x32xbf16>
    %cst_18 = arith.constant dense<0.000000e+00> : vector<8x128xf32>
    %19 = tpu.matmul %18, %11, %cst_18 {dimension_numbers = #tpu.dot_dimension_numbers<[1], [0], [0], [1], [0, 0, 1, 1], [], []>} : vector<8x32xbf16>, vector<32x128xbf16>, vector<8x128xf32> -> vector<8x128xf32>
    %20 = arith.addf %17, %19 : vector<8x128xf32>
    %21 = vector.extract_strided_slice %20 {offsets = [0, 0], sizes = [8, 96], strides = [1, 1]} : vector<8x128xf32> to vector<8x96xf32>
    %22 = arith.negf %21 : vector<8x96xf32>
    %23 = math.exp %22 : vector<8x96xf32>
    %cst_19 = arith.constant 1.000000e+00 : f32
    %24 = vector.broadcast %cst_19 : f32 to vector<8x96xf32>
    %25 = arith.addf %24, %23 : vector<8x96xf32>
    %26 = arith.divf %24, %25 : vector<8x96xf32>
    %27 = vector.extract_strided_slice %20 {offsets = [0, 96], sizes = [8, 32], strides = [1, 1]} : vector<8x128xf32> to vector<8x32xf32>
    %28 = math.tanh %27 : vector<8x32xf32>
    %29 = vector.extract_strided_slice %26 {offsets = [0, 0], sizes = [8, 32], strides = [1, 1]} : vector<8x96xf32> to vector<8x32xf32>
    %30 = vector.extract_strided_slice %26 {offsets = [0, 32], sizes = [8, 32], strides = [1, 1]} : vector<8x96xf32> to vector<8x32xf32>
    %31 = vector.extract_strided_slice %26 {offsets = [0, 64], sizes = [8, 32], strides = [1, 1]} : vector<8x96xf32> to vector<8x32xf32>
    %32 = arith.mulf %30, %13 : vector<8x32xf32>
    %33 = arith.mulf %29, %28 : vector<8x32xf32>
    %34 = arith.addf %32, %33 : vector<8x32xf32>
    %35 = math.tanh %34 : vector<8x32xf32>
    %36 = arith.mulf %31, %35 : vector<8x32xf32>
    %c1_i32 = arith.constant 1 : i32
    %c8_i32_20 = arith.constant 8 : i32
    %37 = arith.muli %c1_i32, %c8_i32_20 : i32
    %38 = tpu.assume_multiple %37, 8 : i32
    %39 = arith.index_cast %38 : i32 to index
    %c0_21 = arith.constant 0 : index
    %40 = vector.load %arg9[%39, %c0_21] : memref<64x128xf32, #tpu.memory_space<vmem>>, vector<8x128xf32>
    %41 = arith.truncf %36 : vector<8x32xf32> to vector<8x32xbf16>
    %cst_22 = arith.constant dense<0.000000e+00> : vector<8x128xf32>
    %42 = tpu.matmul %41, %11, %cst_22 {dimension_numbers = #tpu.dot_dimension_numbers<[1], [0], [0], [1], [0, 0, 1, 1], [], []>} : vector<8x32xbf16>, vector<32x128xbf16>, vector<8x128xf32> -> vector<8x128xf32>
    %43 = arith.addf %40, %42 : vector<8x128xf32>
    %44 = vector.extract_strided_slice %43 {offsets = [0, 0], sizes = [8, 96], strides = [1, 1]} : vector<8x128xf32> to vector<8x96xf32>
    %45 = arith.negf %44 : vector<8x96xf32>
    %46 = math.exp %45 : vector<8x96xf32>
    %cst_23 = arith.constant 1.000000e+00 : f32
    %47 = vector.broadcast %cst_23 : f32 to vector<8x96xf32>
    %48 = arith.addf %47, %46 : vector<8x96xf32>
    %49 = arith.divf %47, %48 : vector<8x96xf32>
    %50 = vector.extract_strided_slice %43 {offsets = [0, 96], sizes = [8, 32], strides = [1, 1]} : vector<8x128xf32> to vector<8x32xf32>
    %51 = math.tanh %50 : vector<8x32xf32>
    %52 = vector.extract_strided_slice %49 {offsets = [0, 0], sizes = [8, 32], strides = [1, 1]} : vector<8x96xf32> to vector<8x32xf32>
    %53 = vector.extract_strided_slice %49 {offsets = [0, 32], sizes = [8, 32], strides = [1, 1]} : vector<8x96xf32> to vector<8x32xf32>
    %54 = vector.extract_strided_slice %49 {offsets = [0, 64], sizes = [8, 32], strides = [1, 1]} : vector<8x96xf32> to vector<8x32xf32>
    %55 = arith.mulf %53, %34 : vector<8x32xf32>
    %56 = arith.mulf %52, %51 : vector<8x32xf32>
    %57 = arith.addf %55, %56 : vector<8x32xf32>
    %58 = math.tanh %57 : vector<8x32xf32>
    %59 = arith.mulf %54, %58 : vector<8x32xf32>
    %c2_i32 = arith.constant 2 : i32
    %c8_i32_24 = arith.constant 8 : i32
    %60 = arith.muli %c2_i32, %c8_i32_24 : i32
    %61 = tpu.assume_multiple %60, 8 : i32
    %62 = arith.index_cast %61 : i32 to index
    %c0_25 = arith.constant 0 : index
    %63 = vector.load %arg9[%62, %c0_25] : memref<64x128xf32, #tpu.memory_space<vmem>>, vector<8x128xf32>
    %64 = arith.truncf %59 : vector<8x32xf32> to vector<8x32xbf16>
    %cst_26 = arith.constant dense<0.000000e+00> : vector<8x128xf32>
    %65 = tpu.matmul %64, %11, %cst_26 {dimension_numbers = #tpu.dot_dimension_numbers<[1], [0], [0], [1], [0, 0, 1, 1], [], []>} : vector<8x32xbf16>, vector<32x128xbf16>, vector<8x128xf32> -> vector<8x128xf32>
    %66 = arith.addf %63, %65 : vector<8x128xf32>
    %67 = vector.extract_strided_slice %66 {offsets = [0, 0], sizes = [8, 96], strides = [1, 1]} : vector<8x128xf32> to vector<8x96xf32>
    %68 = arith.negf %67 : vector<8x96xf32>
    %69 = math.exp %68 : vector<8x96xf32>
    %cst_27 = arith.constant 1.000000e+00 : f32
    %70 = vector.broadcast %cst_27 : f32 to vector<8x96xf32>
    %71 = arith.addf %70, %69 : vector<8x96xf32>
    %72 = arith.divf %70, %71 : vector<8x96xf32>
    %73 = vector.extract_strided_slice %66 {offsets = [0, 96], sizes = [8, 32], strides = [1, 1]} : vector<8x128xf32> to vector<8x32xf32>
    %74 = math.tanh %73 : vector<8x32xf32>
    %75 = vector.extract_strided_slice %72 {offsets = [0, 0], sizes = [8, 32], strides = [1, 1]} : vector<8x96xf32> to vector<8x32xf32>
    %76 = vector.extract_strided_slice %72 {offsets = [0, 32], sizes = [8, 32], strides = [1, 1]} : vector<8x96xf32> to vector<8x32xf32>
    %77 = vector.extract_strided_slice %72 {offsets = [0, 64], sizes = [8, 32], strides = [1, 1]} : vector<8x96xf32> to vector<8x32xf32>
    %78 = arith.mulf %76, %57 : vector<8x32xf32>
    %79 = arith.mulf %75, %74 : vector<8x32xf32>
    %80 = arith.addf %78, %79 : vector<8x32xf32>
    %81 = math.tanh %80 : vector<8x32xf32>
    %82 = arith.mulf %77, %81 : vector<8x32xf32>
    %c3_i32 = arith.constant 3 : i32
    %c8_i32_28 = arith.constant 8 : i32
    %83 = arith.muli %c3_i32, %c8_i32_28 : i32
    %84 = tpu.assume_multiple %83, 8 : i32
    %85 = arith.index_cast %84 : i32 to index
    %c0_29 = arith.constant 0 : index
    %86 = vector.load %arg9[%85, %c0_29] : memref<64x128xf32, #tpu.memory_space<vmem>>, vector<8x128xf32>
    %87 = arith.truncf %82 : vector<8x32xf32> to vector<8x32xbf16>
    %cst_30 = arith.constant dense<0.000000e+00> : vector<8x128xf32>
    %88 = tpu.matmul %87, %11, %cst_30 {dimension_numbers = #tpu.dot_dimension_numbers<[1], [0], [0], [1], [0, 0, 1, 1], [], []>} : vector<8x32xbf16>, vector<32x128xbf16>, vector<8x128xf32> -> vector<8x128xf32>
    %89 = arith.addf %86, %88 : vector<8x128xf32>
    %90 = vector.extract_strided_slice %89 {offsets = [0, 0], sizes = [8, 96], strides = [1, 1]} : vector<8x128xf32> to vector<8x96xf32>
    %91 = arith.negf %90 : vector<8x96xf32>
    %92 = math.exp %91 : vector<8x96xf32>
    %cst_31 = arith.constant 1.000000e+00 : f32
    %93 = vector.broadcast %cst_31 : f32 to vector<8x96xf32>
    %94 = arith.addf %93, %92 : vector<8x96xf32>
    %95 = arith.divf %93, %94 : vector<8x96xf32>
    %96 = vector.extract_strided_slice %89 {offsets = [0, 96], sizes = [8, 32], strides = [1, 1]} : vector<8x128xf32> to vector<8x32xf32>
    %97 = math.tanh %96 : vector<8x32xf32>
    %98 = vector.extract_strided_slice %95 {offsets = [0, 0], sizes = [8, 32], strides = [1, 1]} : vector<8x96xf32> to vector<8x32xf32>
    %99 = vector.extract_strided_slice %95 {offsets = [0, 32], sizes = [8, 32], strides = [1, 1]} : vector<8x96xf32> to vector<8x32xf32>
    %100 = vector.extract_strided_slice %95 {offsets = [0, 64], sizes = [8, 32], strides = [1, 1]} : vector<8x96xf32> to vector<8x32xf32>
    %101 = arith.mulf %99, %80 : vector<8x32xf32>
    %102 = arith.mulf %98, %97 : vector<8x32xf32>
    %103 = arith.addf %101, %102 : vector<8x32xf32>
    %104 = math.tanh %103 : vector<8x32xf32>
    %105 = arith.mulf %100, %104 : vector<8x32xf32>
    %c4_i32 = arith.constant 4 : i32
    %c8_i32_32 = arith.constant 8 : i32
    %106 = arith.muli %c4_i32, %c8_i32_32 : i32
    %107 = tpu.assume_multiple %106, 8 : i32
    %108 = arith.index_cast %107 : i32 to index
    %c0_33 = arith.constant 0 : index
    %109 = vector.load %arg9[%108, %c0_33] : memref<64x128xf32, #tpu.memory_space<vmem>>, vector<8x128xf32>
    %110 = arith.truncf %105 : vector<8x32xf32> to vector<8x32xbf16>
    %cst_34 = arith.constant dense<0.000000e+00> : vector<8x128xf32>
    %111 = tpu.matmul %110, %11, %cst_34 {dimension_numbers = #tpu.dot_dimension_numbers<[1], [0], [0], [1], [0, 0, 1, 1], [], []>} : vector<8x32xbf16>, vector<32x128xbf16>, vector<8x128xf32> -> vector<8x128xf32>
    %112 = arith.addf %109, %111 : vector<8x128xf32>
    %113 = vector.extract_strided_slice %112 {offsets = [0, 0], sizes = [8, 96], strides = [1, 1]} : vector<8x128xf32> to vector<8x96xf32>
    %114 = arith.negf %113 : vector<8x96xf32>
    %115 = math.exp %114 : vector<8x96xf32>
    %cst_35 = arith.constant 1.000000e+00 : f32
    %116 = vector.broadcast %cst_35 : f32 to vector<8x96xf32>
    %117 = arith.addf %116, %115 : vector<8x96xf32>
    %118 = arith.divf %116, %117 : vector<8x96xf32>
    %119 = vector.extract_strided_slice %112 {offsets = [0, 96], sizes = [8, 32], strides = [1, 1]} : vector<8x128xf32> to vector<8x32xf32>
    %120 = math.tanh %119 : vector<8x32xf32>
    %121 = vector.extract_strided_slice %118 {offsets = [0, 0], sizes = [8, 32], strides = [1, 1]} : vector<8x96xf32> to vector<8x32xf32>
    %122 = vector.extract_strided_slice %118 {offsets = [0, 32], sizes = [8, 32], strides = [1, 1]} : vector<8x96xf32> to vector<8x32xf32>
    %123 = vector.extract_strided_slice %118 {offsets = [0, 64], sizes = [8, 32], strides = [1, 1]} : vector<8x96xf32> to vector<8x32xf32>
    %124 = arith.mulf %122, %103 : vector<8x32xf32>
    %125 = arith.mulf %121, %120 : vector<8x32xf32>
    %126 = arith.addf %124, %125 : vector<8x32xf32>
    %127 = math.tanh %126 : vector<8x32xf32>
    %128 = arith.mulf %123, %127 : vector<8x32xf32>
    %c5_i32 = arith.constant 5 : i32
    %c8_i32_36 = arith.constant 8 : i32
    %129 = arith.muli %c5_i32, %c8_i32_36 : i32
    %130 = tpu.assume_multiple %129, 8 : i32
    %131 = arith.index_cast %130 : i32 to index
    %c0_37 = arith.constant 0 : index
    %132 = vector.load %arg9[%131, %c0_37] : memref<64x128xf32, #tpu.memory_space<vmem>>, vector<8x128xf32>
    %133 = arith.truncf %128 : vector<8x32xf32> to vector<8x32xbf16>
    %cst_38 = arith.constant dense<0.000000e+00> : vector<8x128xf32>
    %134 = tpu.matmul %133, %11, %cst_38 {dimension_numbers = #tpu.dot_dimension_numbers<[1], [0], [0], [1], [0, 0, 1, 1], [], []>} : vector<8x32xbf16>, vector<32x128xbf16>, vector<8x128xf32> -> vector<8x128xf32>
    %135 = arith.addf %132, %134 : vector<8x128xf32>
    %136 = vector.extract_strided_slice %135 {offsets = [0, 0], sizes = [8, 96], strides = [1, 1]} : vector<8x128xf32> to vector<8x96xf32>
    %137 = arith.negf %136 : vector<8x96xf32>
    %138 = math.exp %137 : vector<8x96xf32>
    %cst_39 = arith.constant 1.000000e+00 : f32
    %139 = vector.broadcast %cst_39 : f32 to vector<8x96xf32>
    %140 = arith.addf %139, %138 : vector<8x96xf32>
    %141 = arith.divf %139, %140 : vector<8x96xf32>
    %142 = vector.extract_strided_slice %135 {offsets = [0, 96], sizes = [8, 32], strides = [1, 1]} : vector<8x128xf32> to vector<8x32xf32>
    %143 = math.tanh %142 : vector<8x32xf32>
    %144 = vector.extract_strided_slice %141 {offsets = [0, 0], sizes = [8, 32], strides = [1, 1]} : vector<8x96xf32> to vector<8x32xf32>
    %145 = vector.extract_strided_slice %141 {offsets = [0, 32], sizes = [8, 32], strides = [1, 1]} : vector<8x96xf32> to vector<8x32xf32>
    %146 = vector.extract_strided_slice %141 {offsets = [0, 64], sizes = [8, 32], strides = [1, 1]} : vector<8x96xf32> to vector<8x32xf32>
    %147 = arith.mulf %145, %126 : vector<8x32xf32>
    %148 = arith.mulf %144, %143 : vector<8x32xf32>
    %149 = arith.addf %147, %148 : vector<8x32xf32>
    %150 = math.tanh %149 : vector<8x32xf32>
    %151 = arith.mulf %146, %150 : vector<8x32xf32>
    %c6_i32 = arith.constant 6 : i32
    %c8_i32_40 = arith.constant 8 : i32
    %152 = arith.muli %c6_i32, %c8_i32_40 : i32
    %153 = tpu.assume_multiple %152, 8 : i32
    %154 = arith.index_cast %153 : i32 to index
    %c0_41 = arith.constant 0 : index
    %155 = vector.load %arg9[%154, %c0_41] : memref<64x128xf32, #tpu.memory_space<vmem>>, vector<8x128xf32>
    %156 = arith.truncf %151 : vector<8x32xf32> to vector<8x32xbf16>
    %cst_42 = arith.constant dense<0.000000e+00> : vector<8x128xf32>
    %157 = tpu.matmul %156, %11, %cst_42 {dimension_numbers = #tpu.dot_dimension_numbers<[1], [0], [0], [1], [0, 0, 1, 1], [], []>} : vector<8x32xbf16>, vector<32x128xbf16>, vector<8x128xf32> -> vector<8x128xf32>
    %158 = arith.addf %155, %157 : vector<8x128xf32>
    %159 = vector.extract_strided_slice %158 {offsets = [0, 0], sizes = [8, 96], strides = [1, 1]} : vector<8x128xf32> to vector<8x96xf32>
    %160 = arith.negf %159 : vector<8x96xf32>
    %161 = math.exp %160 : vector<8x96xf32>
    %cst_43 = arith.constant 1.000000e+00 : f32
    %162 = vector.broadcast %cst_43 : f32 to vector<8x96xf32>
    %163 = arith.addf %162, %161 : vector<8x96xf32>
    %164 = arith.divf %162, %163 : vector<8x96xf32>
    %165 = vector.extract_strided_slice %158 {offsets = [0, 96], sizes = [8, 32], strides = [1, 1]} : vector<8x128xf32> to vector<8x32xf32>
    %166 = math.tanh %165 : vector<8x32xf32>
    %167 = vector.extract_strided_slice %164 {offsets = [0, 0], sizes = [8, 32], strides = [1, 1]} : vector<8x96xf32> to vector<8x32xf32>
    %168 = vector.extract_strided_slice %164 {offsets = [0, 32], sizes = [8, 32], strides = [1, 1]} : vector<8x96xf32> to vector<8x32xf32>
    %169 = vector.extract_strided_slice %164 {offsets = [0, 64], sizes = [8, 32], strides = [1, 1]} : vector<8x96xf32> to vector<8x32xf32>
    %170 = arith.mulf %168, %149 : vector<8x32xf32>
    %171 = arith.mulf %167, %166 : vector<8x32xf32>
    %172 = arith.addf %170, %171 : vector<8x32xf32>
    %173 = math.tanh %172 : vector<8x32xf32>
    %174 = arith.mulf %169, %173 : vector<8x32xf32>
    %c7_i32 = arith.constant 7 : i32
    %c8_i32_44 = arith.constant 8 : i32
    %175 = arith.muli %c7_i32, %c8_i32_44 : i32
    %176 = tpu.assume_multiple %175, 8 : i32
    %177 = arith.index_cast %176 : i32 to index
    %c0_45 = arith.constant 0 : index
    %178 = vector.load %arg9[%177, %c0_45] : memref<64x128xf32, #tpu.memory_space<vmem>>, vector<8x128xf32>
    %179 = arith.truncf %174 : vector<8x32xf32> to vector<8x32xbf16>
    %cst_46 = arith.constant dense<0.000000e+00> : vector<8x128xf32>
    %180 = tpu.matmul %179, %11, %cst_46 {dimension_numbers = #tpu.dot_dimension_numbers<[1], [0], [0], [1], [0, 0, 1, 1], [], []>} : vector<8x32xbf16>, vector<32x128xbf16>, vector<8x128xf32> -> vector<8x128xf32>
    %181 = arith.addf %178, %180 : vector<8x128xf32>
    %182 = vector.extract_strided_slice %181 {offsets = [0, 0], sizes = [8, 96], strides = [1, 1]} : vector<8x128xf32> to vector<8x96xf32>
    %183 = arith.negf %182 : vector<8x96xf32>
    %184 = math.exp %183 : vector<8x96xf32>
    %cst_47 = arith.constant 1.000000e+00 : f32
    %185 = vector.broadcast %cst_47 : f32 to vector<8x96xf32>
    %186 = arith.addf %185, %184 : vector<8x96xf32>
    %187 = arith.divf %185, %186 : vector<8x96xf32>
    %188 = vector.extract_strided_slice %181 {offsets = [0, 96], sizes = [8, 32], strides = [1, 1]} : vector<8x128xf32> to vector<8x32xf32>
    %189 = math.tanh %188 : vector<8x32xf32>
    %190 = vector.extract_strided_slice %187 {offsets = [0, 0], sizes = [8, 32], strides = [1, 1]} : vector<8x96xf32> to vector<8x32xf32>
    %191 = vector.extract_strided_slice %187 {offsets = [0, 32], sizes = [8, 32], strides = [1, 1]} : vector<8x96xf32> to vector<8x32xf32>
    %192 = vector.extract_strided_slice %187 {offsets = [0, 64], sizes = [8, 32], strides = [1, 1]} : vector<8x96xf32> to vector<8x32xf32>
    %193 = arith.mulf %191, %172 : vector<8x32xf32>
    %194 = arith.mulf %190, %189 : vector<8x32xf32>
    %195 = arith.addf %193, %194 : vector<8x32xf32>
    %196 = math.tanh %195 : vector<8x32xf32>
    %197 = arith.mulf %192, %196 : vector<8x32xf32>
    %c8_i32_48 = arith.constant 8 : i32
    %c0_49 = arith.constant 0 : index
    %c0_50 = arith.constant 0 : index
    %198 = vector.load %arg10[%c0_49, %c0_50] : memref<8x32xf32, #tpu.memory_space<vmem>>, vector<8x32xf32>
    tpu.vector_store %arg10[%c0_49, %c0_50], %197 {strides = array<i32>} : memref<8x32xf32, #tpu.memory_space<vmem>>, vector<8x32xf32>,
    %c0_51 = arith.constant 0 : index
    %c0_52 = arith.constant 0 : index
    %199 = vector.load %arg11[%c0_51, %c0_52] : memref<8x32xf32, #tpu.memory_space<vmem>>, vector<8x32xf32>
    tpu.vector_store %arg11[%c0_51, %c0_52], %195 {strides = array<i32>} : memref<8x32xf32, #tpu.memory_space<vmem>>, vector<8x32xf32>,
    %c0_i32_53 = arith.constant 0 : i32
    %200 = arith.cmpi eq, %arg1, %c0_i32_53 : i32
    %201 = arith.extui %200 : i1 to i32
    %c0_i32_54 = arith.constant 0 : i32
    %202 = arith.cmpi ne, %201, %c0_i32_54 : i32
    scf.if %202 {
      %203 = arith.truncf %197 : vector<8x32xf32> to vector<8x32xbf16>
      %c0_55 = arith.constant 0 : index
      %c0_56 = arith.constant 0 : index
      %204 = vector.load %arg6[%c0_55, %c0_56] : memref<32x128xbf16, #tpu.memory_space<vmem>>, vector<32x128xbf16>
      %cst_57 = arith.constant dense<0.000000e+00> : vector<8x128xf32>
      %205 = tpu.matmul %203, %204, %cst_57 {dimension_numbers = #tpu.dot_dimension_numbers<[1], [0], [0], [1], [0, 0, 1, 1], [], []>} : vector<8x32xbf16>, vector<32x128xbf16>, vector<8x128xf32> -> vector<8x128xf32>
      %c0_58 = arith.constant 0 : index
      %c0_59 = arith.constant 0 : index
      %206 = vector.load %arg7[%c0_58, %c0_59] : memref<1x128xf32, #tpu.memory_space<vmem>>, vector<1x128xf32>
      %207 = vector.broadcast %206 : vector<1x128xf32> to vector<8x128xf32>
      %208 = arith.addf %205, %207 : vector<8x128xf32>
      %c0_60 = arith.constant 0 : index
      %c0_61 = arith.constant 0 : index
      %209 = vector.load %arg8[%c0_60, %c0_61] : memref<8x128xf32, #tpu.memory_space<vmem>>, vector<8x128xf32>
      tpu.vector_store %arg8[%c0_60, %c0_61], %208 {strides = array<i32>} : memref<8x128xf32, #tpu.memory_space<vmem>>, vector<8x128xf32>,
    } else {
    }
    return
  }
  func.func @transform_0(%arg0: i32, %arg1: i32) -> (i32, i32, i32, i32) {
    %c0_i32 = arith.constant 0 : i32
    %c0_i32_0 = arith.constant 0 : i32
    %c0_i32_1 = arith.constant 0 : i32
    return %arg0, %arg1, %c0_i32, %c0_i32_0 : i32, i32, i32, i32
  }
  func.func @transform_1(%arg0: i32, %arg1: i32) -> (i32, i32) {
    %c0_i32 = arith.constant 0 : i32
    %c0_i32_0 = arith.constant 0 : i32
    %c0_i32_1 = arith.constant 0 : i32
    return %c0_i32, %c0_i32_0 : i32, i32
  }
  func.func @transform_2(%arg0: i32, %arg1: i32) -> (i32, i32) {
    %c0_i32 = arith.constant 0 : i32
    %c0_i32_0 = arith.constant 0 : i32
    %c0_i32_1 = arith.constant 0 : i32
    return %c0_i32, %c0_i32_0 : i32, i32
  }
  func.func @transform_3(%arg0: i32, %arg1: i32) -> (i32, i32) {
    %c0_i32 = arith.constant 0 : i32
    %c0_i32_0 = arith.constant 0 : i32
    %c0_i32_1 = arith.constant 0 : i32
    return %c0_i32, %c0_i32_0 : i32, i32
  }
  func.func @transform_4(%arg0: i32, %arg1: i32) -> (i32, i32) {
    %c0_i32 = arith.constant 0 : i32
    %c0_i32_0 = arith.constant 0 : i32
    %c0_i32_1 = arith.constant 0 : i32
    return %c0_i32, %c0_i32_0 : i32, i32
  }
  func.func @transform_5(%arg0: i32, %arg1: i32) -> (i32, i32) {
    %c0_i32 = arith.constant 0 : i32
    %c0_i32_0 = arith.constant 0 : i32
    %c0_i32_1 = arith.constant 0 : i32
    return %c0_i32, %c0_i32_0 : i32, i32
  }
  func.func @transform_6(%arg0: i32, %arg1: i32) -> (i32, i32) {
    %c0_i32 = arith.constant 0 : i32
    %c0_i32_0 = arith.constant 0 : i32
    return %arg0, %c0_i32 : i32, i32
  }
}

</mosaic_0001>

<bundles_post_ra>
// kernel: tpu_custom_call.1
= control target key start
LH: loop header
LB: loop body
LE: loop exit
PB: predicated region body
PF: predicated region fallthrough
CT: control target
= control target key end

     0   :  { %v1119_v1 = vmov 0.0   ;;  %vm75_vm0 = vcmask 130048   ;;  %vm29_vm1 = vcmask 261120   ;;  %vm1120_vm2 = vmmov 0   ;;  %s1342_s0 = inlined_call_operand.vmem [shape: bf16[1,1,64,16], index: 0, kind: input, shape index: {}]   ;;  %s1343_s1 = inlined_call_operand.vmem [shape: bf16[16,128], index: 1, kind: input, shape index: {}]   ;;  %s1344_s2 = inlined_call_operand.vmem [shape: bf16[32,128], index: 2, kind: input, shape index: {}]   ;;  %s1345_s3 = inlined_call_operand.vmem [shape: f32[1,128], index: 3, kind: input, shape index: {}]   ;;  %s1346_s4 = inlined_call_operand.vmem [shape: bf16[32,128], index: 4, kind: input, shape index: {}]   ;;  %s1347_s5 = inlined_call_operand.vmem [shape: f32[1,128], index: 5, kind: input, shape index: {}]   ;;  %s1348_s6 = inlined_call_operand.hbm [shape: f32[8,128], index: 6, kind: output, shape index: {}]  }
   0x1   :  { %v1022_v0 = vld [vmem:[%s1343_s1] sm:$0xff]   ;;  %944 = vmatprep.subr.bf16.mxu1 %v1119_v1  ;;  %v1025_v4 = vld [vmem:[%s1342_s0 + $0x8] sm:$0xff]   ;;  %30 = vst.msk [vmem:[#allocation3] sm:$0xff] %vm29_vm1, %v1119_v1  ;;  %31 = vst.msk [vmem:[#allocation4] sm:$0xff] %vm29_vm1, %v1119_v1  ;;  %948 = vmatprep.mubr.msk.bf16.mxu1 %vm1120_vm2, %v1119_v1 }
   0x2   :  { %v1167_v2 = vld [vmem:[%s1344_s2] sm:$0xff]   ;;  %934 = vmatprep.subr.bf16.mxu0 %v1022_v0  ;;  %v1181_v5 = vld [vmem:[%s1344_s2 + $0x8] sm:$0xff]  }
   0x3   :  { %v1024_v3 = vld [vmem:[%s1342_s0] sm:$0xff]   ;;  %935 = vmatpush3.bf16.msra.mxu0 %v1022_v0  ;;  %945 = vmatpush3.bf16.msra.mxu1 %v1167_v2 }
   0x4   :  { %936 = vmatprep.mubr.msk.bf16.mxu0 %vm75_vm0, %v1024_v3  ;;  %946 = vmatprep.subr.bf16.mxu1 %v1119_v1 }
   0x5   :  { %960 = vmatprep.subr.bf16.mxu0 %v1119_v1 }
   0x6   :  { %937 = vmatmul.mubr.msk.bf16.vlgmr.msra.gmra.mrb[0].mxu0 %vm75_vm0, %v1025_v4 }
   0x7   :  { %947 = vmatpush3.bf16.msra.mxu1 %v1181_v5  ;;  %961 = vmatpush3.bf16.msra.mxu0 %v1167_v2 }
   0x8   :  { %11 = vsyncpa [#allocation6], 0  ;;  %952 = vmatprep.subr.bf16.mxu1 %v1119_v1  ;;  %962 = vmatprep.subr.bf16.mxu0 %v1119_v1  ;;  %v165_v6 = vld [vmem:[#allocation3] sm:$0xff]  ;;  %s1121_s7 = smov 32   ;;  %v166_v20 = vld [vmem:[#allocation4] sm:$0xff]  ;;  %s1123_s15 = smov 96  }
   0x9   :  { %v168_v7 = vpack.c.bf16 %v165_v6, %v165_v6  ;;  %v1209_v10 = vld [vmem:[%s1345_s3] ss:$0 sm:$0xff]  ;;  %s1122_s3 = smov 64   ;;  %v1027_v52 = vld [vmem:[%s1342_s0 + $0x10] sm:$0xff]   ;;  %v1028_v53 = vld [vmem:[%s1342_s0 + $0x18] sm:$0xff]   ;;  %s1124_s17 = smov [#allocation5]  }
   0xa   :  { %940 = vmatprep.mubr.msk.bf16.mxu0 %vm75_vm0, %v1027_v52  ;;  %s862_s18 = sshll.u32 %s1124_s17, 4  ;;  %s863_s18 = int_to_ptr.vmem [resolvable:$true] %s862_s18 }
   0xb   :  { %963 = vmatpush3.bf16.msra.mxu0 %v1181_v5  ;;  %949 = vmatmul.mubr.msk.bf16.vlgmr.msra.gmra.mrb[0].mxu1 %vm29_vm1, %v168_v7  ;;  %s1095_s19 = scalar_lea.vmem %s863_s18, 128  ;;  %p1100_p1 = scmp.lt.s32.totalorder %s863_s18, %s863_s18 }
   0xc   :  { %976 = vmatprep.subr.bf16.mxu0 %v1119_v1  ;;  %953 = vmatpush3.bf16.msra.mxu1 %v1167_v2  ;;  %p1096_p0 = scmp.ne.s32.totalorder %s863_s18, %s1095_s19  ;;  %p1101_p2 = scmp.lt.s32.totalorder %s1095_s19, %s1095_s19 }
   0xd   :  { %956 = vmatprep.mubr.msk.bf16.mxu1 %vm1120_vm2, %v1119_v1  ;;  %954 = vmatprep.subr.bf16.mxu1 %v1119_v1 }
   0xe   :  { %941 = vmatmul.mubr.msk.bf16.gmra.mrb[4].mxu0 %vm75_vm0, %v1028_v53  ;;  %p1102_p3 = por %p1101_p2, %p1100_p1 }
   0xf   :  { %964 = vmatprep.mubr.msk.bf16.mxu0 %vm1120_vm2, %v1119_v1 }
  0x10   :  { %955 = vmatpush3.bf16.msra.mxu1 %v1181_v5  ;;  %p1103_p4 = pnand %p1102_p3, %p1096_p0 }
  0x11   :  { %968 = vmatprep.subr.bf16.mxu1 %v1119_v1 }
  0xd9   :  { %v1204_v8 = vpop.f32.mrb[0].mxu0 }
  0xda   :  { %v122_v9 = vpop.f32.mrb[1].mxu0  ;;  %v131_v63 = vadd.f32 %v1204_v8, %v1209_v10 }
  0xdb   :  { %v1211_v11 = vpop.f32.mrb[2].mxu0  ;;  %v123_v13 = vadd.f32 %v1209_v10, %v122_v9 }
  0xdc   :  { %v125_v12 = vpop.f32.mrb[3].mxu0 }
  0xdd   :  { %v126_v36 = vadd.f32 %v1209_v10, %v125_v12 }
  0xde   :  { %v219_v14 = vpop.f32.mrb[0].mxu1 }
  0xdf   :  { %v225_v15 = vadd.f32 %v219_v14, %v123_v13  ;;  %v950_v16 = vpop.f32.mrb[1].mxu1 }
  0xe0   :  { %v222_v17 = vpop.f32.mrb[2].mxu1 }
  0xe1   :  { %1031 = vtanh.f32 %v225_v15  ;;  %v951_v18 = vpop.f32.mrb[3].mxu1  ;;  %v883_v21 = vmul.f32 -1.442695, %v225_v15  ;;  %v1241_v58 = vpop.f32.mrb[4].mxu0 }
  0xe2   :  { %v1243_v59 = vpop.f32.mrb[5].mxu0 }
  0xe3   :  { %1033 = vpow2.f32 %v883_v21  ;;  %v1245_v60 = vpop.f32.mrb[6].mxu0 }
  0xe4   :  { %v1247_v61 = vpop.f32.mrb[7].mxu0 }
  0xeb   :  { %v1032_v19 = vpop.eup %1031 }
  0xec   :  { %239 = vrot.lane.b32.xlu0 %v1032_v19, %s1121_s7 }
  0xed   :  { %v1034_v22 = vpop.eup %1033 }
  0xee   :  { %v229_v23 = vadd.f32 1.0, %v1034_v22 }
  0xf0   :  { %234 = vrot.lane.b32.xlu0 %v166_v20, %s1121_s7  ;;  %1035 = vrcp.f32 %v229_v23 }
  0xfa   :  { %v1036_v24 = vpop.eup %1035 }
 0x15e   :  { %v240_v25 = vpop.permute.xlu0 %239 }
 0x15f   :  { %v242_v26 = vmul.f32 %v1036_v24, %v240_v25  ;;  %v134_v25 = vadd.f32 %v1211_v11, %v1209_v10 }
 0x161   :  { %244 = vrot.lane.b32.xlu1 %v242_v26, %s1121_s7 }
 0x162   :  { %v235_v27 = vpop.permute.xlu0 %234 }
 0x163   :  { %v237_v28 = vmul.f32 %v1036_v24, %v235_v27 }
 0x1d3   :  { %v245_v29 = vpop.permute.xlu1 %244 }
 0x1d4   :  { %v247_v30 = vadd.f32 %v245_v29, %v237_v28 }
 0x1d6   :  { %1037 = vtanh.f32 %v247_v30 }
 0x1e0   :  { %v1038_v31 = vpop.eup %1037 }
 0x1e1   :  { %250 = vrot.lane.b32.xlu1 %v1038_v31, %s1121_s7 }
 0x253   :  { %v251_v32 = vpop.permute.xlu1 %250 }
 0x254   :  { %v253_v33 = vmul.f32 %v1036_v24, %v251_v32 }
 0x256   :  { %v256_v34 = vpack.c.bf16 %v253_v33, %v253_v33 }
 0x258   :  { %258 = vrot.lane.b32.xlu0 %v256_v34, %s1122_s3 }
 0x2ca   :  { %v259_v35 = vpop.permute.xlu0 %258 }
 0x2cb   :  { %957 = vmatmul.mubr.msk.bf16.vlgmr.msra.gmra.mrb[4].mxu1 %vm29_vm1, %v259_v35 }
 0x2cc   :  { %969 = vmatpush3.bf16.msra.mxu1 %v1167_v2  ;;  %972 = vmatprep.mubr.msk.bf16.mxu1 %vm1120_vm2, %v1119_v1 }
 0x2cd   :  { %970 = vmatprep.subr.bf16.mxu1 %v1119_v1 }
 0x2d0   :  { %971 = vmatpush3.bf16.msra.mxu1 %v1181_v5 }
 0x2d1   :  { %984 = vmatprep.subr.bf16.mxu1 %v1119_v1 }
 0x39e   :  { %v297_v37 = vpop.f32.mrb[4].mxu1 }
 0x39f   :  { %v303_v38 = vadd.f32 %v297_v37, %v126_v36  ;;  %v958_v39 = vpop.f32.mrb[5].mxu1 }
 0x3a0   :  { %v300_v40 = vpop.f32.mrb[6].mxu1 }
 0x3a1   :  { %1039 = vtanh.f32 %v303_v38  ;;  %v959_v41 = vpop.f32.mrb[7].mxu1  ;;  %v885_v43 = vmul.f32 -1.442695, %v303_v38 }
 0x3a3   :  { %1041 = vpow2.f32 %v885_v43 }
 0x3ab   :  { %v1040_v42 = vpop.eup %1039 }
 0x3ac   :  { %313 = vrot.lane.b32.xlu1 %v1040_v42, %s1121_s7 }
 0x3ad   :  { %v1042_v44 = vpop.eup %1041 }
 0x3ae   :  { %v307_v45 = vadd.f32 1.0, %v1042_v44 }
 0x3b0   :  { %1043 = vrcp.f32 %v307_v45  ;;  %v139_v45 = vadd.f32 %v1209_v10, %v1243_v59 }
 0x3ba   :  { %v1044_v46 = vpop.eup %1043 }
 0x3bb   :  { %v311_v49 = vmul.f32 %v1044_v46, %v247_v30 }
 0x41e   :  { %v314_v47 = vpop.permute.xlu1 %313 }
 0x41f   :  { %v316_v48 = vmul.f32 %v1044_v46, %v314_v47 }
 0x421   :  { %318 = vrot.lane.b32.xlu0 %v316_v48, %s1121_s7 }
 0x493   :  { %v319_v50 = vpop.permute.xlu0 %318 }
 0x494   :  { %v321_v51 = vadd.f32 %v319_v50, %v311_v49 }
 0x496   :  { %1045 = vtanh.f32 %v321_v51 }
 0x4a0   :  { %v1046_v54 = vpop.eup %1045 }
 0x4a1   :  { %324 = vrot.lane.b32.xlu1 %v1046_v54, %s1121_s7 }
 0x513   :  { %v325_v55 = vpop.permute.xlu1 %324 }
 0x514   :  { %v327_v56 = vmul.f32 %v1044_v46, %v325_v55 }
 0x516   :  { %v330_v57 = vpack.c.bf16 %v327_v56, %v327_v56 }
 0x518   :  { %332 = vrot.lane.b32.xlu0 %v330_v57, %s1122_s3 }
 0x58a   :  { %v333_v62 = vpop.permute.xlu0 %332 }
 0x58b   :  { %965 = vmatmul.mubr.msk.bf16.vlgmr.msra.gmra.mrb[8].mxu0 %vm29_vm1, %v333_v62 }
 0x58c   :  { %977 = vmatpush3.bf16.msra.mxu0 %v1167_v2  ;;  %980 = vmatprep.mubr.msk.bf16.mxu0 %vm1120_vm2, %v1119_v1 }
 0x58d   :  { %978 = vmatprep.subr.bf16.mxu0 %v1119_v1 }
 0x590   :  { %979 = vmatpush3.bf16.msra.mxu0 %v1181_v5 }
 0x591   :  { %992 = vmatprep.subr.bf16.mxu0 %v1119_v1 }
 0x65e   :  { %v371_v0 = vpop.f32.mrb[8].mxu0 }
 0x65f   :  { %v377_v3 = vadd.f32 %v371_v0, %v131_v63  ;;  %v966_v4 = vpop.f32.mrb[9].mxu0 }
 0x660   :  { %v374_v6 = vpop.f32.mrb[10].mxu0 }
 0x661   :  { %1047 = vtanh.f32 %v377_v3  ;;  %v967_v7 = vpop.f32.mrb[11].mxu0  ;;  %v887_v12 = vmul.f32 -1.442695, %v377_v3 }
 0x663   :  { %1049 = vpow2.f32 %v887_v12 }
 0x66b   :  { %v1048_v9 = vpop.eup %1047 }
 0x66c   :  { %387 = vrot.lane.b32.xlu1 %v1048_v9, %s1121_s7  ;;  %v142_v9 = vadd.f32 %v1209_v10, %v1247_v61 }
 0x66d   :  { %v1050_v13 = vpop.eup %1049 }
 0x66e   :  { %v381_v14 = vadd.f32 1.0, %v1050_v13 }
 0x670   :  { %1051 = vrcp.f32 %v381_v14 }
 0x67a   :  { %v1052_v15 = vpop.eup %1051 }
 0x67b   :  { %v385_v8 = vmul.f32 %v1052_v15, %v321_v51 }
 0x6de   :  { %v388_v16 = vpop.permute.xlu1 %387 }
 0x6df   :  { %v390_v17 = vmul.f32 %v1052_v15, %v388_v16 }
 0x6e1   :  { %392 = vrot.lane.b32.xlu0 %v390_v17, %s1121_s7 }
 0x753   :  { %v393_v18 = vpop.permute.xlu0 %392 }
 0x754   :  { %v395_v19 = vadd.f32 %v393_v18, %v385_v8 }
 0x756   :  { %1053 = vtanh.f32 %v395_v19 }
 0x760   :  { %v1054_v20 = vpop.eup %1053 }
 0x761   :  { %398 = vrot.lane.b32.xlu1 %v1054_v20, %s1121_s7 }
 0x7d3   :  { %v399_v21 = vpop.permute.xlu1 %398 }
 0x7d4   :  { %v401_v22 = vmul.f32 %v1052_v15, %v399_v21 }
 0x7d6   :  { %v404_v23 = vpack.c.bf16 %v401_v22, %v401_v22 }
 0x7d8   :  { %406 = vrot.lane.b32.xlu0 %v404_v23, %s1122_s3 }
 0x84a   :  { %v407_v24 = vpop.permute.xlu0 %406 }
 0x84b   :  { %973 = vmatmul.mubr.msk.bf16.vlgmr.msra.gmra.mrb[8].mxu1 %vm29_vm1, %v407_v24 }
 0x84c   :  { %985 = vmatpush3.bf16.msra.mxu1 %v1167_v2  ;;  %988 = vmatprep.mubr.msk.bf16.mxu1 %vm1120_vm2, %v1119_v1 }
 0x84d   :  { %986 = vmatprep.subr.bf16.mxu1 %v1119_v1 }
 0x850   :  { %987 = vmatpush3.bf16.msra.mxu1 %v1181_v5 }
 0x851   :  { %1000 = vmatprep.subr.bf16.mxu1 %v1119_v1 }
 0x91e   :  { %v445_v26 = vpop.f32.mrb[8].mxu1 }
 0x91f   :  { %v451_v27 = vadd.f32 %v445_v26, %v134_v25  ;;  %v974_v28 = vpop.f32.mrb[9].mxu1 }
 0x920   :  { %v448_v29 = vpop.f32.mrb[10].mxu1  ;;  %v147_v28 = vadd.f32 %v1241_v58, %v1209_v10 }
 0x921   :  { %1055 = vtanh.f32 %v451_v27  ;;  %v975_v30 = vpop.f32.mrb[11].mxu1  ;;  %v889_v32 = vmul.f32 -1.442695, %v451_v27 }
 0x923   :  { %1057 = vpow2.f32 %v889_v32 }
 0x92b   :  { %v1056_v31 = vpop.eup %1055 }
 0x92c   :  { %461 = vrot.lane.b32.xlu1 %v1056_v31, %s1121_s7 }
 0x92d   :  { %v1058_v33 = vpop.eup %1057 }
 0x92e   :  { %v455_v34 = vadd.f32 1.0, %v1058_v33 }
 0x930   :  { %1059 = vrcp.f32 %v455_v34 }
 0x93a   :  { %v1060_v35 = vpop.eup %1059 }
 0x93b   :  { %v459_v11 = vmul.f32 %v1060_v35, %v395_v19 }
 0x99e   :  { %v462_v36 = vpop.permute.xlu1 %461 }
 0x99f   :  { %v464_v37 = vmul.f32 %v1060_v35, %v462_v36 }
 0x9a1   :  { %466 = vrot.lane.b32.xlu0 %v464_v37, %s1121_s7 }
 0xa13   :  { %v467_v38 = vpop.permute.xlu0 %466 }
 0xa14   :  { %v469_v39 = vadd.f32 %v467_v38, %v459_v11 }
 0xa16   :  { %1061 = vtanh.f32 %v469_v39 }
 0xa20   :  { %v1062_v40 = vpop.eup %1061 }
 0xa21   :  { %472 = vrot.lane.b32.xlu1 %v1062_v40, %s1121_s7 }
 0xa93   :  { %v473_v41 = vpop.permute.xlu1 %472 }
 0xa94   :  { %v475_v42 = vmul.f32 %v1060_v35, %v473_v41 }
 0xa96   :  { %v478_v43 = vpack.c.bf16 %v475_v42, %v475_v42 }
 0xa98   :  { %480 = vrot.lane.b32.xlu0 %v478_v43, %s1122_s3 }
 0xb0a   :  { %v481_v44 = vpop.permute.xlu0 %480 }
 0xb0b   :  { %981 = vmatmul.mubr.msk.bf16.vlgmr.msra.gmra.mrb[12].mxu0 %vm29_vm1, %v481_v44 }
 0xb0c   :  { %993 = vmatpush3.bf16.msra.mxu0 %v1167_v2  ;;  %996 = vmatprep.mubr.msk.bf16.mxu0 %vm1120_vm2, %v1119_v1 }
 0xb0d   :  { %994 = vmatprep.subr.bf16.mxu0 %v1119_v1 }
 0xb10   :  { %995 = vmatpush3.bf16.msra.mxu0 %v1181_v5 }
 0xb11   :  { %1008 = vmatprep.subr.bf16.mxu0 %v1119_v1 }
 0xbde   :  { %v519_v46 = vpop.f32.mrb[12].mxu0 }
 0xbdf   :  { %v525_v47 = vadd.f32 %v519_v46, %v139_v45  ;;  %v982_v48 = vpop.f32.mrb[13].mxu0 }
 0xbe0   :  { %v522_v49 = vpop.f32.mrb[14].mxu0 }
 0xbe1   :  { %1063 = vtanh.f32 %v525_v47  ;;  %v983_v50 = vpop.f32.mrb[15].mxu0  ;;  %v891_v52 = vmul.f32 -1.442695, %v525_v47  ;;  %v150_v47 = vadd.f32 %v1245_v60, %v1209_v10 }
 0xbe3   :  { %1065 = vpow2.f32 %v891_v52 }
 0xbeb   :  { %v1064_v51 = vpop.eup %1063 }
 0xbec   :  { %535 = vrot.lane.b32.xlu1 %v1064_v51, %s1121_s7 }
 0xbed   :  { %v1066_v53 = vpop.eup %1065 }
 0xbee   :  { %v529_v54 = vadd.f32 1.0, %v1066_v53 }
 0xbf0   :  { %1067 = vrcp.f32 %v529_v54 }
 0xbfa   :  { %v1068_v55 = vpop.eup %1067 }
 0xbfb   :  { %v533_v59 = vmul.f32 %v1068_v55, %v469_v39 }
 0xc5e   :  { %v536_v56 = vpop.permute.xlu1 %535 }
 0xc5f   :  { %v538_v57 = vmul.f32 %v1068_v55, %v536_v56 }
 0xc61   :  { %540 = vrot.lane.b32.xlu0 %v538_v57, %s1121_s7 }
 0xcd3   :  { %v541_v62 = vpop.permute.xlu0 %540 }
 0xcd4   :  { %v543_v63 = vadd.f32 %v541_v62, %v533_v59 }
 0xcd6   :  { %1069 = vtanh.f32 %v543_v63 }
 0xce0   :  { %v1070_v0 = vpop.eup %1069 }
 0xce1   :  { %546 = vrot.lane.b32.xlu1 %v1070_v0, %s1121_s7  ;;  %v1029_v0 = vld [vmem:[%s1346_s4] sm:$0xff]  }
 0xd53   :  { %v547_v3 = vpop.permute.xlu1 %546 }
 0xd54   :  { %v549_v4 = vmul.f32 %v1068_v55, %v547_v3  ;;  %v1030_v3 = vld [vmem:[%s1346_s4 + $0x8] sm:$0xff]  }
 0xd56   :  { %v552_v6 = vpack.c.bf16 %v549_v4, %v549_v4 }
 0xd58   :  { %554 = vrot.lane.b32.xlu0 %v552_v6, %s1122_s3 }
 0xdca   :  { %v555_v7 = vpop.permute.xlu0 %554 }
 0xdcb   :  { %989 = vmatmul.mubr.msk.bf16.vlgmr.msra.gmra.mrb[12].mxu1 %vm29_vm1, %v555_v7 }
 0xdcc   :  { %1001 = vmatpush3.bf16.msra.mxu1 %v1167_v2  ;;  %1004 = vmatprep.mubr.msk.bf16.mxu1 %vm1120_vm2, %v1119_v1 }
 0xdcd   :  { %1002 = vmatprep.subr.bf16.mxu1 %v1119_v1 }
 0xdd0   :  { %1003 = vmatpush3.bf16.msra.mxu1 %v1181_v5 }
 0xe9e   :  { %v593_v12 = vpop.f32.mrb[12].mxu1 }
 0xe9f   :  { %v599_v13 = vadd.f32 %v593_v12, %v142_v9  ;;  %v990_v14 = vpop.f32.mrb[13].mxu1 }
 0xea0   :  { %v596_v15 = vpop.f32.mrb[14].mxu1  ;;  %v898_v14 = vld [vmem:[%s1347_s5] ss:$0 sm:$0xff] }
 0xea1   :  { %1071 = vtanh.f32 %v599_v13  ;;  %v991_v16 = vpop.f32.mrb[15].mxu1  ;;  %v893_v2 = vmul.f32 -1.442695, %v599_v13 }
 0xea3   :  { %1073 = vpow2.f32 %v893_v2 }
 0xeab   :  { %v1072_v17 = vpop.eup %1071 }
 0xeac   :  { %609 = vrot.lane.b32.xlu1 %v1072_v17, %s1121_s7 }
 0xead   :  { %v1074_v8 = vpop.eup %1073 }
 0xeae   :  { %v603_v18 = vadd.f32 1.0, %v1074_v8 }
 0xeb0   :  { %1075 = vrcp.f32 %v603_v18 }
 0xeba   :  { %v1076_v19 = vpop.eup %1075 }
 0xebb   :  { %v607_v61 = vmul.f32 %v1076_v19, %v543_v63 }
 0xf1e   :  { %v610_v20 = vpop.permute.xlu1 %609 }
 0xf1f   :  { %v612_v5 = vmul.f32 %v1076_v19, %v610_v20 }
 0xf21   :  { %614 = vrot.lane.b32.xlu0 %v612_v5, %s1121_s7 }
 0xf93   :  { %v615_v21 = vpop.permute.xlu0 %614 }
 0xf94   :  { %v617_v22 = vadd.f32 %v615_v21, %v607_v61 }
 0xf96   :  { %1077 = vtanh.f32 %v617_v22 }
 0xfa0   :  { %v1078_v23 = vpop.eup %1077 }
 0xfa1   :  { %620 = vrot.lane.b32.xlu1 %v1078_v23, %s1121_s7 }
0x1013   :  { %v621_v24 = vpop.permute.xlu1 %620 }
0x1014   :  { %v623_v25 = vmul.f32 %v1076_v19, %v621_v24 }
0x1016   :  { %v626_v26 = vpack.c.bf16 %v623_v25, %v623_v25 }
0x1018   :  { %628 = vrot.lane.b32.xlu0 %v626_v26, %s1122_s3 }
0x108a   :  { %v629_v27 = vpop.permute.xlu0 %628 }
0x108b   :  { %997 = vmatmul.mubr.msk.bf16.vlgmr.msra.gmra.mrb[16].mxu0 %vm29_vm1, %v629_v27 }
0x108c   :  { %1012 = vmatprep.mubr.msk.bf16.mxu0 %vm1120_vm2, %v1119_v1  ;;  %1009 = vmatpush3.bf16.msra.mxu0 %v1029_v0 }
0x108d   :  { %1010 = vmatprep.subr.bf16.mxu0 %v1119_v1 }
0x1090   :  { %1011 = vmatpush3.bf16.msra.mxu0 %v1030_v3 }
0x115e   :  { %v667_v29 = vpop.f32.mrb[16].mxu0 }
0x115f   :  { %v673_v30 = vadd.f32 %v667_v29, %v147_v28  ;;  %v998_v31 = vpop.f32.mrb[17].mxu0 }
0x1160   :  { %v670_v32 = vpop.f32.mrb[18].mxu0 }
0x1161   :  { %1079 = vtanh.f32 %v673_v30  ;;  %v999_v33 = vpop.f32.mrb[19].mxu0  ;;  %v895_v35 = vmul.f32 -1.442695, %v673_v30 }
0x1163   :  { %1081 = vpow2.f32 %v895_v35 }
0x116b   :  { %v1080_v34 = vpop.eup %1079 }
0x116c   :  { %683 = vrot.lane.b32.xlu1 %v1080_v34, %s1121_s7 }
0x116d   :  { %v1082_v36 = vpop.eup %1081 }
0x116e   :  { %v677_v37 = vadd.f32 1.0, %v1082_v36 }
0x1170   :  { %1083 = vrcp.f32 %v677_v37 }
0x117a   :  { %v1084_v11 = vpop.eup %1083 }
0x117b   :  { %v681_v58 = vmul.f32 %v1084_v11, %v617_v22 }
0x11de   :  { %v684_v38 = vpop.permute.xlu1 %683 }
0x11df   :  { %v686_v39 = vmul.f32 %v1084_v11, %v684_v38 }
0x11e1   :  { %688 = vrot.lane.b32.xlu0 %v686_v39, %s1121_s7 }
0x1253   :  { %v689_v40 = vpop.permute.xlu0 %688 }
0x1254   :  { %v691_v41 = vadd.f32 %v689_v40, %v681_v58 }
0x1256   :  { %1085 = vtanh.f32 %v691_v41 }
0x1260   :  { %v1086_v42 = vpop.eup %1085 }
0x1261   :  { %694 = vrot.lane.b32.xlu1 %v1086_v42, %s1121_s7 }
0x12d3   :  { %v695_v43 = vpop.permute.xlu1 %694 }
0x12d4   :  { %v697_v44 = vmul.f32 %v1084_v11, %v695_v43 }
0x12d6   :  { %v700_v45 = vpack.c.bf16 %v697_v44, %v697_v44 }
0x12d8   :  { %702 = vrot.lane.b32.xlu0 %v700_v45, %s1122_s3 }
0x134a   :  { %v703_v46 = vpop.permute.xlu0 %702 }
0x134b   :  { %1005 = vmatmul.mubr.msk.bf16.vlgmr.msra.gmra.mrb[16].mxu1 %vm29_vm1, %v703_v46 }
0x141e   :  { %v741_v48 = vpop.f32.mrb[16].mxu1 }
0x141f   :  { %v747_v49 = vadd.f32 %v741_v48, %v150_v47  ;;  %v1006_v50 = vpop.f32.mrb[17].mxu1 }
0x1420   :  { %v744_v51 = vpop.f32.mrb[18].mxu1 }
0x1421   :  { %1087 = vtanh.f32 %v747_v49  ;;  %v1007_v52 = vpop.f32.mrb[19].mxu1  ;;  %v897_v54 = vmul.f32 -1.442695, %v747_v49 }
0x1423   :  { %1089 = vpow2.f32 %v897_v54 }
0x142b   :  { %v1088_v53 = vpop.eup %1087 }
0x142c   :  { %757 = vrot.lane.b32.xlu1 %v1088_v53, %s1121_s7 }
0x142d   :  { %v1090_v55 = vpop.eup %1089 }
0x142e   :  { %v751_v56 = vadd.f32 1.0, %v1090_v55 }
0x1430   :  { %1091 = vrcp.f32 %v751_v56 }
0x143a   :  { %v1092_v57 = vpop.eup %1091 }
0x143b   :  { %v755_v10 = vmul.f32 %v1092_v57, %v691_v41 }
0x149e   :  { %v758_v59 = vpop.permute.xlu1 %757 }
0x149f   :  { %v760_v62 = vmul.f32 %v1092_v57, %v758_v59 }
0x14a1   :  { %762 = vrot.lane.b32.xlu0 %v760_v62, %s1121_s7 }
0x1513   :  { %v763_v60 = vpop.permute.xlu0 %762 }
0x1514   :  { %v765_v63 = vadd.f32 %v763_v60, %v755_v10 }
0x1516   :  { %1093 = vtanh.f32 %v765_v63 }
0x1520   :  { %v1094_v4 = vpop.eup %1093 }
0x1521   :  { %768 = vrot.lane.b32.xlu1 %v1094_v4, %s1121_s7 }
0x1593   :  { %v769_v6 = vpop.permute.xlu1 %768 }
0x1594   :  { %v771_v7 = vmul.f32 %v1092_v57, %v769_v6 }
0x1596   :  { %v785_v9 = vpack.c.bf16 %v771_v7, %v771_v7  ;;  %773 = vrot.lane.b32.xlu1 %v771_v7, %s1122_s3 }
0x1598   :  { %798 = vrot.lane.b32.xlu0 %v785_v9, %s1122_s3 }
0x159c   :  { %778 = vrot.lane.b32.xlu0 %v765_v63, %s1123_s15 }
0x1608   :  { %v774_v12 = vpop.permute.xlu1 %773 }
0x1609   :  { %776 = vst.msk [vmem:[#allocation3] sm:$0xff] %vm29_vm1, %v774_v12 }
0x160a   :  { %v799_v13 = vpop.permute.xlu0 %798 }
0x160b   :  { %1013 = vmatmul.mubr.msk.bf16.vlgmr.msra.gmra.mrb[20].mxu0 %vm29_vm1, %v799_v13 }
0x160e   :  { %v779_v1 = vpop.permute.xlu0 %778 }
0x160f   :  { %781 = vst.msk [vmem:[#allocation4] sm:$0xff] %vm29_vm1, %v779_v1 }
0x16de   :  { %v849_v15 = vpop.f32.mrb[20].mxu0 }
0x16df   :  { %v850_v16 = vadd.f32 %v898_v14, %v849_v15  ;;  %v1014_v17 = vpop.f32.mrb[21].mxu0 }
0x16e0   :  { %v852_v2 = vpop.f32.mrb[22].mxu0 }
0x16e1   :  { %855 = vst [vmem:[#allocation5] sm:$0xff] %v850_v16  ;;  %v1015_v8 = vpop.f32.mrb[23].mxu0 }
0x16e2   :  { %1106 = shalt.err (!%p1103_p4)
}
0x16e3   :  { %s1107_s5 = scalar_lea.hbm %s1348_s6, 128 }
0x16e4   :  { %p1108_p5 = scmp.ne.s32.totalorder %s1348_s6, %s1107_s5  ;;  %p1111_p6 = scmp.lt.u32.totalorder %s1107_s5, %s1348_s6 }
0x16e6   :  { %p1113_p7 = pnand %p1111_p6, %p1108_p5 }
0x16e8   :  { %1116 = shalt.err (!%p1113_p7)
}
0x16e9   :  { %865 = dma.vmem_to_hbm [thread:$0]  %s863_s18, 128, %s1348_s6, [#allocation6]  }
0x16ea   :  { %1117 = dma.done.wait [#allocation6], 128  }
0x16eb   :  { %1118 = vsyncadd [#allocation6], 4294967168 }
0x16ec   :  { %869 = vsyncpa [#allocation6], 1 }

</bundles_post_ra>
